<compile_context>
chip_gen: v7x
topology: tpu7x:2x2x1
jax: 0.10.0
libtpu: 0.0.40
codegen_flags: <defaults>
</compile_context>

<pallas_src>
import numpy as np
import jax
import jax.numpy as jnp
from jax.experimental import pallas as pl
from jax.experimental.pallas import tpu as pltpu

EPS = 1e-5
DIFF_PAD = 16  # padded width of the (t_center - n_center_j) diff block (9 real cols)


def _round_up(x, m):
    return (x + m - 1) // m * m


def geometric_kernel(d_ref, wlin_ref, wdiff_ref, w34_ref, b1_ref, w2_ref, b2_ref, o_ref):
    d = d_ref[...].astype(jnp.float32)                                        # (TF, 48)

    # ---- rebuild() + Conv1d(3->mid,k=4,s=4) + BN1, all folded into matmuls ----
    lin = jnp.dot(d, wlin_ref[...], preferred_element_type=jnp.float32)       # (TF, mid)
    diffs = jnp.dot(d, wdiff_ref[...], preferred_element_type=jnp.float32)    # (TF, 16)
    h = lin + jnp.dot(jnp.abs(diffs), w34_ref[...],
                      preferred_element_type=jnp.float32)
    h = jnp.maximum(h + b1_ref[...], 0.0)                                     # ReLU

    # ---- Conv1d(mid->out, k=1) + BN2 + ReLU ----
    y = jnp.dot(h, w2_ref[...], preferred_element_type=jnp.float32)
    y = jnp.maximum(y + b2_ref[...], 0.0)                                     # (TF, out)

    # Store lane-dense, already transposed to (out_c, TF) -> final (B, out_c, F).
    o_ref[...] = y.T.astype(o_ref.dtype)


def geometric_forward(data, folded_params, *, tile_f=2048, input_dtype=jnp.float32):
    """data: (B, F, 4, 12) float -> (B, out_channels, F), matching PyTorch NCL output.

    tile_f: faces per grid step (use ~2048 on v5e, 4096+ on v6e/v7x for large F).
    input_dtype: jnp.float32 or jnp.bfloat16 (bf16 halves HBM input traffic).
    """
    B, F, K, C = data.shape
    assert K == 4 and C == 12
    wlin, wdiff, w34, b1, w2, b2 = folded_params
    mid = wlin.shape[1]
    out_c = w2.shape[1]

    # Tile sizing: if the whole (8-rounded) face axis fits in one tile, use a
    # single tile per batch (block == full dim -> no 128-multiple requirement);
    # otherwise force a 128-multiple tile so output stores stay unmasked.
    f8 = _round_up(F, 8)
    tile_req = max(128, _round_up(int(tile_f), 128))
    if f8 <= tile_req:
        tile = f8
        f_pad = f8
    else:
        tile = tile_req
        f_pad = _round_up(F, tile)

    d = data.reshape(B, F, K * C)
    if f_pad != F:
        d = jnp.pad(d, ((0, 0), (0, f_pad - F), (0, 0)))
    d = d.astype(input_dtype)

    grid = (B, f_pad // tile)
    y = pl.pallas_call(
        geometric_kernel,
        out_shape=jax.ShapeDtypeStruct((B, out_c, f_pad), jnp.float32),
        grid=grid,
        in_specs=[
            pl.BlockSpec((None, tile, K * C), lambda b, f: (b, f, 0)),   # face rows
            pl.BlockSpec((K * C, mid), lambda b, f: (0, 0)),             # Wlin (BN folded)
            pl.BlockSpec((K * C, DIFF_PAD), lambda b, f: (0, 0)),        # Dmat
            pl.BlockSpec((DIFF_PAD, mid), lambda b, f: (0, 0)),          # W34 (BN folded)
            pl.BlockSpec((1, mid), lambda b, f: (0, 0)),                 # bias1
            pl.BlockSpec((mid, out_c), lambda b, f: (0, 0)),             # W2 (BN folded)
            pl.BlockSpec((1, out_c), lambda b, f: (0, 0)),               # bias2
        ],
        out_specs=pl.BlockSpec((None, out_c, tile), lambda b, f: (b, 0, f)),
        compiler_params=pltpu.CompilerParams(
            dimension_semantics=("parallel", "parallel")),
    )(d, wlin, wdiff, w34, b1, w2, b2)

    if f_pad != F:
        y = y[:, :, :F]
    return y


def init_raw_params(key, middle_channels, out_channels):
    """Deterministic synthetic parameters mirroring the PyTorch module."""
    ks = jax.random.split(key, 12)
    f32 = jnp.float32
    W1 = 0.2 * jax.random.normal(ks[0], (middle_channels, 3, 4), f32)   # Conv1d(3->mid,k=4)
    b1 = 0.1 * jax.random.normal(ks[1], (middle_channels,), f32)
    g1 = 1.0 + 0.1 * jax.random.normal(ks[2], (middle_channels,), f32)  # BN1 gamma
    be1 = 0.05 * jax.random.normal(ks[3], (middle_channels,), f32)      # BN1 beta
    m1 = 0.1 * jax.random.normal(ks[4], (middle_channels,), f32)        # BN1 running_mean
    v1 = 0.5 + 0.5 * jnp.abs(jax.random.normal(ks[5], (middle_channels,), f32))
    W2 = 0.2 * jax.random.normal(ks[6], (out_channels, middle_channels, 1), f32)
    b2 = 0.1 * jax.random.normal(ks[7], (out_channels,), f32)
    g2 = 1.0 + 0.1 * jax.random.normal(ks[8], (out_channels,), f32)
    be2 = 0.05 * jax.random.normal(ks[9], (out_channels,), f32)
    m2 = 0.1 * jax.random.normal(ks[10], (out_channels,), f32)
    v2 = 0.5 + 0.5 * jnp.abs(jax.random.normal(ks[11], (out_channels,), f32))
    return (W1, b1, g1, be1, m1, v1, W2, b2, g2, be2, m2, v2)


def fold_params(raw):
    """Fold rebuild(), conv biases and eval-mode BN into the kernel's matrices."""
    W1, b1, g1, be1, m1, v1, W2, b2, g2, be2, m2, v2 = raw
    mid = W1.shape[0]
    out_c = W2.shape[0]

    s1 = g1 / jnp.sqrt(v1 + EPS)
    bias1 = (b1 - m1) * s1 + be1
    s2 = g2 / jnp.sqrt(v2 + EPS)
    bias2 = (b2 - m2) * s2 + be2

    # Flattened Conv1 weight: W1p[k*3+ic, c] = W1[c, ic, k]
    W1p = jnp.transpose(W1, (2, 1, 0)).reshape(12, mid)

    # Linear map d(48) -> [t_center(3), t_normal(3)]
    A = np.zeros((48, 6), np.float32)
    for i in range(3):
        A[i, i] = A[3 + i, i] = A[6 + i, i] = 1.0 / 3.0
        A[9 + i, 3 + i] = 1.0

    # Diff map d(48) -> [t_center - n_center_j for j=1..3], zero-padded to 16 cols.
    Dm = np.zeros((48, DIFF_PAD), np.float32)
    for j in range(3):
        for i in range(3):
            col = 3 * j + i
            for r in (i, 3 + i, 6 + i):
                Dm[r, col] += 1.0 / 3.0
            base = 12 * (j + 1)
            for r in (base + i, base + 3 + i, base + 6 + i):
                Dm[r, col] -= 1.0 / 3.0

    # third + fourth (identical) contributions share W1 slots k=2 and k=3.
    Wsum = W1p[6:9] + W1p[9:12]                                  # (3, mid)
    W34 = jnp.concatenate(
        [jnp.tile(Wsum, (3, 1)), jnp.zeros((DIFF_PAD - 9, mid), jnp.float32)], axis=0)

    Wlin = jnp.asarray(A) @ W1p[:6]                              # (48, mid)
    W2p = W2[:, :, 0].T                                          # (mid, out)

    return (
        (Wlin * s1[None, :]).astype(jnp.float32),
        jnp.asarray(Dm),
        (W34 * s1[None, :]).astype(jnp.float32),
        bias1.reshape(1, mid).astype(jnp.float32),
        (W2p * s2[None, :]).astype(jnp.float32),
        bias2.reshape(1, out_c).astype(jnp.float32),
    )


def reference_forward(data, raw):
    """Pure-JAX mirror of the PyTorch module (eval-mode BN)."""
    W1, b1, g1, be1, m1, v1, W2, b2, g2, be2, m2, v2 = raw
    B, F = data.shape[0], data.shape[1]
    target = data[:, :, 0]
    neighbors = data[:, :, 1:]
    t_point, t_normal = target[:, :, :9], target[:, :, 9:]
    n_point = neighbors[:, :, :, :9]
    t_center = (t_point[:, :, :3] + t_point[:, :, 3:6] + t_point[:, :, 6:]) / 3
    n_center = (n_point[:, :, :, :3] + n_point[:, :, :, 3:6] + n_point[:, :, :, 6:]) / 3
    midterm = jnp.repeat(t_center[:, :, None, :], 3, axis=2)
    third = jnp.sum(jnp.abs(midterm - n_center), axis=2)
    fourth = jnp.sum(jnp.abs(midterm - n_center), axis=2)
    ag = jnp.concatenate(
        [t_center[:, :, None], t_normal[:, :, None], third[:, :, None], fourth[:, :, None]],
        axis=2,
    )
    in_data = jnp.transpose(ag.reshape(B, -1, 3), (0, 2, 1)).astype(jnp.float32)  # (B,3,4F)
    xr = in_data.reshape(B, 3, F, 4)
    h = jnp.einsum("bifk,cik->bcf", xr, W1) + b1[None, :, None]
    h = (h - m1[None, :, None]) / jnp.sqrt(v1 + EPS)[None, :, None] * g1[None, :, None] + be1[None, :, None]
    h = jnp.maximum(h, 0.0)
    y = jnp.einsum("bmf,om->bof", h, W2[:, :, 0]) + b2[None, :, None]
    y = (y - m2[None, :, None]) / jnp.sqrt(v2 + EPS)[None, :, None] * g2[None, :, None] + be2[None, :, None]
    return jnp.maximum(y, 0.0)


if __name__ == "__main__":
    key = jax.random.PRNGKey(0)
    kd, kp = jax.random.split(key)

    middle_channels, out_channels = 32, 64
    raw = init_raw_params(kp, middle_channels, out_channels)
    folded = fold_params(raw)

    # Small demo (single tile per batch, no padding).
    B, F = 2, 16
    data = jax.random.normal(kd, (B, F, 4, 12), jnp.float32)
    y = jax.block_until_ready(geometric_forward(data, folded))
    y_ref = reference_forward(data, raw)
    assert y.shape == (B, out_channels, F), y.shape
    err = float(jnp.max(jnp.abs(y - y_ref)))
    assert err < 1e-3, f"f32 mismatch vs reference: {err}"

    # Padded / multi-tile path: F=200 -> tile=128, F padded to 256, grid=(2, 2).
    B2, F2 = 2, 200
    data2 = jax.random.normal(jax.random.PRNGKey(1), (B2, F2, 4, 12), jnp.float32)
    y2 = jax.block_until_ready(geometric_forward(data2, folded, tile_f=128))
    y2_ref = reference_forward(data2, raw)
    assert y2.shape == (B2, out_channels, F2), y2.shape
    err2 = float(jnp.max(jnp.abs(y2 - y2_ref)))
    assert err2 < 1e-3, f"padded f32 mismatch vs reference: {err2}"

    # bf16-input path (recommended on v6e/v7x: halves the dominant HBM read).
    y3 = jax.block_until_ready(geometric_forward(data, folded, input_dtype=jnp.bfloat16))
    err3 = float(jnp.max(jnp.abs(y3 - y_ref)))
    assert err3 < 5e-2, f"bf16 mismatch vs reference: {err3}"

    print("KERNEL_OK")
</pallas_src>

<mosaic_0001>
module attributes {stable_mosaic.version = 11 : i64} {
  func.func @geometric_kernel(%arg0: i32, %arg1: i32, %arg2: memref<1x16x48xf32, #tpu.memory_space<vmem>>, %arg3: memref<48x32xf32, #tpu.memory_space<vmem>>, %arg4: memref<48x16xf32, #tpu.memory_space<vmem>>, %arg5: memref<16x32xf32, #tpu.memory_space<vmem>>, %arg6: memref<1x32xf32, #tpu.memory_space<vmem>>, %arg7: memref<32x64xf32, #tpu.memory_space<vmem>>, %arg8: memref<1x64xf32, #tpu.memory_space<vmem>>, %arg9: memref<1x64x16xf32, #tpu.memory_space<vmem>>) attributes {dimension_semantics = [#tpu.dimension_semantics<parallel>, #tpu.dimension_semantics<parallel>], iteration_bounds = array<i64: 2, 1>, scalar_prefetch = 0 : i64, scratch_operands = 0 : i64, tpu.core_type = #tpu.core_type<tc>, window_params = [{transform_indices = @transform_0, window_bounds = array<i64: 1, 16, 48>}, {pipeline_mode = #tpu.pipeline_mode<synchronous>, transform_indices = @transform_1, window_bounds = array<i64: 48, 32>}, {pipeline_mode = #tpu.pipeline_mode<synchronous>, transform_indices = @transform_2, window_bounds = array<i64: 48, 16>}, {pipeline_mode = #tpu.pipeline_mode<synchronous>, transform_indices = @transform_3, window_bounds = array<i64: 16, 32>}, {pipeline_mode = #tpu.pipeline_mode<synchronous>, transform_indices = @transform_4, window_bounds = array<i64: 1, 32>}, {pipeline_mode = #tpu.pipeline_mode<synchronous>, transform_indices = @transform_5, window_bounds = array<i64: 32, 64>}, {pipeline_mode = #tpu.pipeline_mode<synchronous>, transform_indices = @transform_6, window_bounds = array<i64: 1, 64>}, {transform_indices = @transform_7, window_bounds = array<i64: 1, 64, 16>}]} {
    %c0 = arith.constant 0 : index
    %c0_0 = arith.constant 0 : index
    %c0_1 = arith.constant 0 : index
    %0 = vector.load %arg2[%c0, %c0_0, %c0_1] : memref<1x16x48xf32, #tpu.memory_space<vmem>>, vector<1x16x48xf32>
    %1 = vector.shape_cast %0 : vector<1x16x48xf32> to vector<16x48xf32>
    %c0_2 = arith.constant 0 : index
    %c0_3 = arith.constant 0 : index
    %2 = vector.load %arg3[%c0_2, %c0_3] : memref<48x32xf32, #tpu.memory_space<vmem>>, vector<48x32xf32>
    %cst = arith.constant dense<0.000000e+00> : vector<16x32xf32>
    %3 = tpu.matmul %1, %2, %cst {dimension_numbers = #tpu.dot_dimension_numbers<[1], [0], [0], [1], [0, 0, 1, 1], [], []>} : vector<16x48xf32>, vector<48x32xf32>, vector<16x32xf32> -> vector<16x32xf32>
    %c0_4 = arith.constant 0 : index
    %c0_5 = arith.constant 0 : index
    %4 = vector.load %arg4[%c0_4, %c0_5] : memref<48x16xf32, #tpu.memory_space<vmem>>, vector<48x16xf32>
    %cst_6 = arith.constant dense<0.000000e+00> : vector<16x16xf32>
    %5 = tpu.matmul %1, %4, %cst_6 {dimension_numbers = #tpu.dot_dimension_numbers<[1], [0], [0], [1], [0, 0, 1, 1], [], []>} : vector<16x48xf32>, vector<48x16xf32>, vector<16x16xf32> -> vector<16x16xf32>
    %6 = math.absf %5 : vector<16x16xf32>
    %c0_7 = arith.constant 0 : index
    %c0_8 = arith.constant 0 : index
    %7 = vector.load %arg5[%c0_7, %c0_8] : memref<16x32xf32, #tpu.memory_space<vmem>>, vector<16x32xf32>
    %cst_9 = arith.constant dense<0.000000e+00> : vector<16x32xf32>
    %8 = tpu.matmul %6, %7, %cst_9 {dimension_numbers = #tpu.dot_dimension_numbers<[1], [0], [0], [1], [0, 0, 1, 1], [], []>} : vector<16x16xf32>, vector<16x32xf32>, vector<16x32xf32> -> vector<16x32xf32>
    %9 = arith.addf %3, %8 : vector<16x32xf32>
    %c0_10 = arith.constant 0 : index
    %c0_11 = arith.constant 0 : index
    %10 = vector.load %arg6[%c0_10, %c0_11] : memref<1x32xf32, #tpu.memory_space<vmem>>, vector<1x32xf32>
    %11 = vector.broadcast %10 : vector<1x32xf32> to vector<16x32xf32>
    %12 = arith.addf %9, %11 : vector<16x32xf32>
    %cst_12 = arith.constant 0.000000e+00 : f32
    %13 = vector.broadcast %cst_12 : f32 to vector<16x32xf32>
    %14 = arith.maximumf %12, %13 : vector<16x32xf32>
    %c0_13 = arith.constant 0 : index
    %c0_14 = arith.constant 0 : index
    %15 = vector.load %arg7[%c0_13, %c0_14] : memref<32x64xf32, #tpu.memory_space<vmem>>, vector<32x64xf32>
    %cst_15 = arith.constant dense<0.000000e+00> : vector<16x64xf32>
    %16 = tpu.matmul %14, %15, %cst_15 {dimension_numbers = #tpu.dot_dimension_numbers<[1], [0], [0], [1], [0, 0, 1, 1], [], []>} : vector<16x32xf32>, vector<32x64xf32>, vector<16x64xf32> -> vector<16x64xf32>
    %c0_16 = arith.constant 0 : index
    %c0_17 = arith.constant 0 : index
    %17 = vector.load %arg8[%c0_16, %c0_17] : memref<1x64xf32, #tpu.memory_space<vmem>>, vector<1x64xf32>
    %18 = vector.broadcast %17 : vector<1x64xf32> to vector<16x64xf32>
    %19 = arith.addf %16, %18 : vector<16x64xf32>
    %cst_18 = arith.constant 0.000000e+00 : f32
    %20 = vector.broadcast %cst_18 : f32 to vector<16x64xf32>
    %21 = arith.maximumf %19, %20 : vector<16x64xf32>
    %22 = tpu.transpose %21, [1, 0] : vector<16x64xf32> -> vector<64x16xf32>
    %c0_19 = arith.constant 0 : index
    %c0_20 = arith.constant 0 : index
    %c0_21 = arith.constant 0 : index
    %23 = vector.load %arg9[%c0_19, %c0_20, %c0_21] : memref<1x64x16xf32, #tpu.memory_space<vmem>>, vector<1x64x16xf32>
    %24 = vector.shape_cast %23 : vector<1x64x16xf32> to vector<64x16xf32>
    %25 = vector.shape_cast %22 : vector<64x16xf32> to vector<1x64x16xf32>
    tpu.vector_store %arg9[%c0_19, %c0_20, %c0_21], %25 {strides = array<i32>} : memref<1x64x16xf32, #tpu.memory_space<vmem>>, vector<1x64x16xf32>,
    return
  }
  func.func @transform_0(%arg0: i32, %arg1: i32) -> (i32, i32, i32) {
    %c0_i32 = arith.constant 0 : i32
    %c0_i32_0 = arith.constant 0 : i32
    return %arg0, %arg1, %c0_i32 : i32, i32, i32
  }
  func.func @transform_1(%arg0: i32, %arg1: i32) -> (i32, i32) {
    %c0_i32 = arith.constant 0 : i32
    %c0_i32_0 = arith.constant 0 : i32
    %c0_i32_1 = arith.constant 0 : i32
    return %c0_i32, %c0_i32_0 : i32, i32
  }
  func.func @transform_2(%arg0: i32, %arg1: i32) -> (i32, i32) {
    %c0_i32 = arith.constant 0 : i32
    %c0_i32_0 = arith.constant 0 : i32
    %c0_i32_1 = arith.constant 0 : i32
    return %c0_i32, %c0_i32_0 : i32, i32
  }
  func.func @transform_3(%arg0: i32, %arg1: i32) -> (i32, i32) {
    %c0_i32 = arith.constant 0 : i32
    %c0_i32_0 = arith.constant 0 : i32
    %c0_i32_1 = arith.constant 0 : i32
    return %c0_i32, %c0_i32_0 : i32, i32
  }
  func.func @transform_4(%arg0: i32, %arg1: i32) -> (i32, i32) {
    %c0_i32 = arith.constant 0 : i32
    %c0_i32_0 = arith.constant 0 : i32
    %c0_i32_1 = arith.constant 0 : i32
    return %c0_i32, %c0_i32_0 : i32, i32
  }
  func.func @transform_5(%arg0: i32, %arg1: i32) -> (i32, i32) {
    %c0_i32 = arith.constant 0 : i32
    %c0_i32_0 = arith.constant 0 : i32
    %c0_i32_1 = arith.constant 0 : i32
    return %c0_i32, %c0_i32_0 : i32, i32
  }
  func.func @transform_6(%arg0: i32, %arg1: i32) -> (i32, i32) {
    %c0_i32 = arith.constant 0 : i32
    %c0_i32_0 = arith.constant 0 : i32
    %c0_i32_1 = arith.constant 0 : i32
    return %c0_i32, %c0_i32_0 : i32, i32
  }
  func.func @transform_7(%arg0: i32, %arg1: i32) -> (i32, i32, i32) {
    %c0_i32 = arith.constant 0 : i32
    %c0_i32_0 = arith.constant 0 : i32
    return %arg0, %c0_i32, %arg1 : i32, i32, i32
  }
}

</mosaic_0001>

<bundles_post_ra>
// kernel: tpu_custom_call.1
= control target key start
LH: loop header
LB: loop body
LE: loop exit
PB: predicated region body
PF: predicated region fallthrough
CT: control target
= control target key end

     0   :  { %s1025_s24 = smov 0   ;;  %s1027_s25 = smov 0   ;;  %s1136_s0 = inlined_call_operand.vmem [shape: f32[2,16,48], index: 0, kind: input, shape index: {}]   ;;  %s1137_s1 = inlined_call_operand.vmem [shape: f32[48,32], index: 1, kind: input, shape index: {}]   ;;  %s1138_s2 = inlined_call_operand.vmem [shape: f32[48,16], index: 2, kind: input, shape index: {}]   ;;  %s1139_s3 = inlined_call_operand.vmem [shape: f32[16,32], index: 3, kind: input, shape index: {}]   ;;  %s1140_s4 = inlined_call_operand.vmem [shape: f32[1,32], index: 4, kind: input, shape index: {}]   ;;  %s1141_s5 = inlined_call_operand.vmem [shape: f32[32,64], index: 5, kind: input, shape index: {}]   ;;  %s1142_s6 = inlined_call_operand.vmem [shape: f32[1,64], index: 6, kind: input, shape index: {}]   ;;  %s1143_s7 = inlined_call_operand.vmem [shape: f32[2,64,16], index: 7, kind: output, shape index: {}]  }
   0x1   :  { %s1029_s26 = smov 0  }
   0x2 LB: > { %s29_s27 = sadd.s32 1, %s979_s25  ;;  %p805_p0 = scmp.ge.s32.totalorder %s983_s26, 1  ;;  %s983_s26 = sphi %s1029_s26, %s17_s26   ;;  %s979_s25 = sphi %s1027_s25, %s1145_s25   ;;  %s975_s24 = sphi %s1025_s24, %s1144_s24  }
   0x3   : > { %p31_p1 = scmp.ge.s32.totalorder %s29_s27, 2  ;;  %p258_p2 = scmp.lt.s32.totalorder %s983_s26, 3 }
   0x5   : > { %s1147_s27 = smov (%p31_p1, %s29_s27), 0  ;;  %p259_p3 = pnand %p805_p0, %p258_p2 }
   0x6   : > { %v323_v0 = vld [vmem:[%s1138_s2] sm:$0xff] (!%p259_p3)  ;;  %v324_v1 = vld [vmem:[%s1138_s2 + $0x8] sm:$0xff] (!%p259_p3)  ;;  %v325_v2 = vld [vmem:[%s1138_s2 + $0x10] sm:$0xff] (!%p259_p3)  ;;  %p298_p4 = scmp.lt.s32.totalorder (!%p259_p3), %s975_s24, 1  ;;  %vm329_vm0 = vcmask (!%p259_p3), 392192   ;;  %vm415_vm1 = vcmask (!%p259_p3), 130048  }
   0x7   : > { %262 = sbr.rel (%p259_p3) target bundleno = 842 (0x34a), region = 48  ;;  %v898_v3 = vpack.c.bf16 (!%p259_p3), %v324_v1, %v323_v0  ;;  %v326_v4 = vld [vmem:[%s1138_s2 + $0x18] sm:$0xff] (!%p259_p3)  ;;  %v327_v6 = vld [vmem:[%s1138_s2 + $0x20] sm:$0xff] (!%p259_p3)  ;;  %v328_v7 = vld [vmem:[%s1138_s2 + $0x28] sm:$0xff] (!%p259_p3)  ;;  %vm594_vm2 = vcmask (!%p259_p3), 261120  }
   0x8   : > { %v902_v5 = vpack.c.bf16 (!%p259_p3), %v326_v4, %v325_v2  ;;  %v906_v8 = vpack.c.bf16 (!%p259_p3), %v328_v7, %v327_v6  ;;  %v413_v11 = vld [vmem:[%s1139_s3] sm:$0xff] (!%p259_p3)  ;;  %v414_v12 = vld [vmem:[%s1139_s3 + $0x8] sm:$0xff] (!%p259_p3)  ;;  %v319_v21 = vld [vmem:[%s1137_s1 + $0x10] sm:$0xff] (!%p259_p3) }
   0x9   : > { %899 = vmatprep.subr.bf16.mxu0 (!%p259_p3), %v898_v3  ;;  %v910_v13 = vpack.c.bf16 (!%p259_p3), %v414_v12, %v413_v11  ;;  %v317_v14 = vld [vmem:[%s1137_s1] sm:$0xff] (!%p259_p3)  ;;  %v318_v15 = vld [vmem:[%s1137_s1 + $0x8] sm:$0xff] (!%p259_p3)  ;;  %v320_v22 = vld [vmem:[%s1137_s1 + $0x18] sm:$0xff] (!%p259_p3) }
   0xa   : > { %901 = vmatpush3.bf16.msra.mxu0 (!%p259_p3), %v898_v3  ;;  %v914_v16 = vpack.c.bf16 (!%p259_p3), %v318_v15, %v317_v14  ;;  %v583_v17 = vld [vmem:[%s1141_s5] sm:$0xff] (!%p259_p3)  ;;  %v584_v18 = vld [vmem:[%s1141_s5 + $0x8] sm:$0xff] (!%p259_p3)  ;;  %v918_v26 = vpack.c.bf16 (!%p259_p3), %v320_v22, %v319_v21  ;;  %v585_v30 = vld [vmem:[%s1141_s5 + $0x10] sm:$0xff] (!%p259_p3) }
   0xb   : > { %903 = vmatprep.subr.bf16.mxu0 (!%p259_p3), %v902_v5  ;;  %911 = vmatprep.subr.bf16.mxu1 (!%p259_p3), %v910_v13  ;;  %v926_v19 = vpack.c.bf16 (!%p259_p3), %v584_v18, %v583_v17  ;;  %v321_v27 = vld [vmem:[%s1137_s1 + $0x20] sm:$0xff] (!%p259_p3)  ;;  %v322_v28 = vld [vmem:[%s1137_s1 + $0x28] sm:$0xff] (!%p259_p3)  ;;  %v586_v31 = vld [vmem:[%s1141_s5 + $0x18] sm:$0xff] (!%p259_p3) }
   0xc   : > { %913 = vmatpush3.bf16.msra.mxu1 (!%p259_p3), %v910_v13  ;;  %v922_v29 = vpack.c.bf16 (!%p259_p3), %v322_v28, %v321_v27  ;;  %v930_v32 = vpack.c.bf16 (!%p259_p3), %v586_v31, %v585_v30  ;;  %v816_v33 = vld [vmem:[%s1140_s4] ss:$0 sm:$0xff] (!%p259_p3) }
   0xd   : > { %915 = vmatprep.subr.bf16.mxu1 (!%p259_p3), %v914_v16  ;;  %v817_v40 = vld [vmem:[%s1142_s6] ss:$0 sm:$0xff] (!%p259_p3) }
   0xe   : > { %s1149_s24 = smov (!%p298_p4, %s975_s24), 1  ;;  %905 = vmatpush3.bf16.msra.mxu0 %v902_v5 }
   0xf   : > { %s822_s17 = sshll.u32 %s1149_s24, 4  ;;  %907 = vmatprep.subr.bf16.mxu0 %v906_v8  ;;  %s823_s11 = sshll.u32 %s1149_s24, 6 }
  0x10   : > { %s305_s20 = scalar_lea.vmem %s1136_s0, %s822_s17  ;;  %s314_s14 = scalar_lea.vmem %s1143_s7, %s823_s11 }
  0x11   : > { %v315_v9 = vld [vmem:[%s305_s20] sm:$0xff]  ;;  %v316_v10 = vld [vmem:[%s305_s20 + $0x8] sm:$0xff] }
  0x12   : > { %862 = vmatprep.mubr.msk.f32.mxu0 %vm329_vm0, %v315_v9  ;;  %909 = vmatpush3.bf16.msra.mxu0 %v906_v8 }
  0x13   : > { %927 = vmatprep.subr.bf16.mxu0 %v926_v19 }
  0x15   : > { %863 = vmatmul.mubr.msk.f32.vlgmr.msra.gmra.mrb[0].mxu0 %vm329_vm0, %v316_v10 }
  0x16   : > { %929 = vmatpush3.bf16.msra.mxu0 %v926_v19 }
  0x17   : > { %931 = vmatprep.subr.bf16.mxu0 %v930_v32 }
  0x1a   : > { %933 = vmatpush3.bf16.msra.mxu0 %v930_v32 }
  0xe8   : > { %v864_v20 = vpop.f32.mrb[0].mxu0 }
  0xe9   : > { %v402_v23 = vpop.f32.mrb[1].mxu0  ;;  %v412_v25 = vand.u32 2147483647, %v864_v20 }
  0xea   : > { %v411_v24 = vand.u32 2147483647, %v402_v23 }
  0xec   : > { %869 = vmatprep.mubr.msk.f32.mxu1 %vm415_vm1, %v411_v24 }
  0xed   : > { %870 = vmatmul.mubr.msk.f32.vlgmr.msra.gmra.mrb[0].mxu1 %vm415_vm1, %v412_v25 }
  0xee   : > { %917 = vmatpush3.bf16.msra.mxu1 %v914_v16  ;;  %884 = vmatprep.mubr.msk.f32.mxu1 %vm329_vm0, %v315_v9 }
  0xef   : > { %919 = vmatprep.subr.bf16.mxu1 %v918_v26 }
  0xf2   : > { %921 = vmatpush3.bf16.msra.mxu1 %v918_v26 }
  0xf3   : > { %923 = vmatprep.subr.bf16.mxu1 %v922_v29 }
  0xf6   : > { %925 = vmatpush3.bf16.msra.mxu1 %v922_v29 }
  0xf9   : > { %885 = vmatmul.mubr.msk.f32.vlgmr.msra.gmra.mrb[0].mxu1 %vm329_vm0, %v316_v10 }
 0x1cc   : > { %v886_v34 = vpop.f32.mrb[0].mxu1 }
 0x1cd   : > { %v580_v35 = vadd.f32 %v886_v34, %v816_v33  ;;  %v563_v36 = vpop.f32.mrb[1].mxu1 }
 0x1ce   : > { %v579_v37 = vadd.f32 %v816_v33, %v563_v36 }
 0x1cf   : > { %v582_v39 = vmax.f32 %v580_v35, 0.0 }
 0x1d0   : > { %v581_v38 = vmax.f32 %v579_v37, 0.0 }
 0x1d2   : > { %895 = vmatprep.mubr.msk.f32.mxu0 %vm594_vm2, %v581_v38 }
 0x1d3   : > { %896 = vmatmul.mubr.msk.f32.vlgmr.msra.gmra.mrb[2].mxu0 %vm594_vm2, %v582_v39 }
 0x2a6   : > { %v897_v41 = vpop.f32.mrb[2].mxu0 }
 0x2a7   : > { %v667_v42 = vpop.f32.mrb[3].mxu0  ;;  %v673_v44 = vadd.f32 %v897_v41, %v817_v40 }
 0x2a8   : > { %v668_v43 = vadd.f32 %v817_v40, %v667_v42 }
 0x2a9   : > { %v677_v46 = vmax.f32 %v673_v44, 0.0 }
 0x2aa   : > { %v676_v45 = vmax.f32 %v668_v43, 0.0 }
 0x2ac   : > { %678 = vxpose.xlu0.b32.start [1/2] (short) (narrow) %v676_v45, 64 }
 0x2b0   : > { %679 = vxpose.xlu0.b32.end [2/2] (short) (narrow) %v677_v46, 64 }
 0x32c   : > { %v694_v47 = vpop.trf.xlu0 }
 0x32d   : > { %710 = vst.msk [vmem:[%s314_s14] sm:$0xff] %vm415_vm1, %v694_v47 }
 0x330   : > { %v695_v48 = vpop.trf.xlu0 }
 0x331   : > { %711 = vst.msk [vmem:[%s314_s14 + $0x8] sm:$0xff] %vm415_vm1, %v695_v48 }
 0x334   : > { %v696_v49 = vpop.trf.xlu0 }
 0x335   : > { %712 = vst.msk [vmem:[%s314_s14 + $0x10] sm:$0xff] %vm415_vm1, %v696_v49 }
 0x338   : > { %v697_v50 = vpop.trf.xlu0 }
 0x339   : > { %713 = vst.msk [vmem:[%s314_s14 + $0x18] sm:$0xff] %vm415_vm1, %v697_v50 }
 0x33c   : > { %v698_v51 = vpop.trf.xlu0 }
 0x33d   : > { %714 = vst.msk [vmem:[%s314_s14 + $0x20] sm:$0xff] %vm415_vm1, %v698_v51 }
 0x340   : > { %v699_v52 = vpop.trf.xlu0 }
 0x341   : > { %715 = vst.msk [vmem:[%s314_s14 + $0x28] sm:$0xff] %vm415_vm1, %v699_v52 }
 0x344   : > { %v700_v53 = vpop.trf.xlu0 }
 0x345   : > { %716 = vst.msk [vmem:[%s314_s14 + $0x30] sm:$0xff] %vm415_vm1, %v700_v53 }
 0x348   : > { %v701_v54 = vpop.trf.xlu0 }
 0x349   : > { %717 = vst.msk [vmem:[%s314_s14 + $0x38] sm:$0xff] %vm415_vm1, %v701_v54 }
 0x34a PF: > { %s17_s26 = sadd.s32 1, %s983_s26   ;;  %s1144_s24 = smov %s979_s25 }
 0x34b   : > { %p14_p5 = scmp.ge.s32.totalorder %s17_s26, 4   ;;  %s1145_s25 = smov %s1147_s27 }
 0x34d   :  { %16 = sbr.rel (!%p14_p5) target bundleno = 2 (0x2), region = 78 }

</bundles_post_ra>
